<compile_context>
chip_gen: v6e
topology: v6e:2x2x1
jax: 0.10.0
libtpu: 0.0.40
codegen_flags: <defaults>
</compile_context>

<pallas_src>
import functools

import jax
import jax.numpy as jnp
from jax.experimental import pallas as pl
from jax.experimental.pallas import tpu as pltpu


def _round_up(x, m):
    return ((x + m - 1) // m) * m


def _vmem_limit_bytes():
    """Generation-aware scoped-VMEM request (3/4 of physical, capped at 96 MiB)."""
    try:
        cap = pltpu.get_tpu_info().vmem_capacity_bytes
    except Exception:
        cap = 64 * 1024 * 1024  # conservative fallback (v7x per-TensorCore)
    return int(min(cap * 3 // 4, 96 * 1024 * 1024))


def _choose_tile_hw(C, HW, itemsize, target_block_bytes=2 * 1024 * 1024):
    """HW tile: multiple of 128 lanes, sized by BYTES (~2 MiB (C, tile) block)
    so double-buffered in+out blocks stay far under scoped VMEM on all
    generations while staying near the measured HBM roofline."""
    hw_r = _round_up(HW, 128)
    lanes_by_bytes = (target_block_bytes // max(1, C * itemsize)) // 128 * 128
    return int(max(128, min(hw_r, lanes_by_bytes)))


# ---------------------------------------------------------------------------
# Fused single-pass kernel: pooling + MLP + sigmoid + rescale, one resident row.
# ---------------------------------------------------------------------------
def _fused_kernel(x_ref, w1_ref, w2_ref, o_ref, *, inv_hw):
    x = x_ref[0].astype(jnp.float32)                          # (C, HW)
    avg = jnp.sum(x, axis=-1, keepdims=True) * inv_hw         # (C, 1)
    mx = jnp.max(x, axis=-1, keepdims=True)                   # (C, 1)
    # Shared MLP applied to both pooled vectors in one (C, 2) matmul pass.
    p = jnp.concatenate([avg, mx], axis=1)                    # (C, 2)
    h = jnp.maximum(
        jnp.dot(w1_ref[...], p, preferred_element_type=jnp.float32), 0.0)  # (Ch, 2)
    y = jnp.dot(w2_ref[...], h, preferred_element_type=jnp.float32)        # (C, 2)
    attn = jax.nn.sigmoid(y[:, 0:1] + y[:, 1:2])              # (C, 1)
    o_ref[0] = (x * attn).astype(o_ref.dtype)                 # rescale resident block


# ---------------------------------------------------------------------------
# Two-pass fallback, Pass 1: tiled pooling + fused MLP + sigmoid -> attn (B,C,1)
# ---------------------------------------------------------------------------
def _pool_mlp_kernel(x_ref, w1_ref, w2_ref, attn_ref, sum_acc, max_acc,
                     *, hw_true, tile_hw, ragged):
    j = pl.program_id(1)
    nj = pl.num_programs(1)

    @pl.when(j == 0)
    def _():
        sum_acc[...] = jnp.zeros_like(sum_acc)
        max_acc[...] = jnp.full_like(max_acc, -jnp.inf)

    x = x_ref[0].astype(jnp.float32)                          # (C, tile_hw)

    def _accumulate(x_for_sum, x_for_max):
        sum_acc[...] = sum_acc[...] + jnp.sum(x_for_sum, axis=-1, keepdims=True)
        max_acc[...] = jnp.maximum(
            max_acc[...], jnp.max(x_for_max, axis=-1, keepdims=True))

    if ragged:
        # No explicit padding of x: out-of-range lanes of the LAST tile are
        # garbage, so mask BOTH reductions there.  Full tiles skip the mask
        # work entirely (pl.when-guarded).
        @pl.when(j < nj - 1)
        def _():
            _accumulate(x, x)

        @pl.when(j == nj - 1)
        def _():
            lane = jax.lax.broadcasted_iota(jnp.int32, x.shape, 1) + j * tile_hw
            valid = lane < hw_true
            _accumulate(jnp.where(valid, x, 0.0), jnp.where(valid, x, -jnp.inf))
    else:
        _accumulate(x, x)

    @pl.when(j == nj - 1)
    def _():
        avg = sum_acc[...] * (1.0 / hw_true)                  # (C, 1)
        p = jnp.concatenate([avg, max_acc[...]], axis=1)      # (C, 2)
        h = jnp.maximum(
            jnp.dot(w1_ref[...], p, preferred_element_type=jnp.float32), 0.0)
        y = jnp.dot(w2_ref[...], h, preferred_element_type=jnp.float32)
        attn_ref[0] = jax.nn.sigmoid(y[:, 0:1] + y[:, 1:2])   # (C, 1)


# ---------------------------------------------------------------------------
# Two-pass fallback, Pass 2: out = attn * x, fully parallel lane-dense tiles.
# ---------------------------------------------------------------------------
def _rescale_kernel(x_ref, attn_ref, o_ref):
    o_ref[...] = (x_ref[...].astype(jnp.float32) * attn_ref[...]).astype(o_ref.dtype)


def channel_attention(x_nchw, w1, w2, *, fused=None, tile_hw=None):
    """x_nchw: (B, C, H, W); w1: (C//16, C, 1, 1); w2: (C, C//16, 1, 1)."""
    B, C, H, W = x_nchw.shape
    Ch = w1.shape[0]
    HW = H * W

    x = x_nchw.reshape(B, C, HW)
    w1m = w1.reshape(Ch, C).astype(jnp.float32)               # (Ch, C)
    w2m = w2.reshape(C, Ch).astype(jnp.float32)               # (C, Ch)

    itemsize = jnp.dtype(x.dtype).itemsize
    vmem_limit = _vmem_limit_bytes()

    # Fused-path budget: 2x-buffered input + output row blocks + f32 temporaries.
    row_in = C * HW * itemsize
    row_f32 = C * HW * 4
    fused_bytes = 4 * row_in + 2 * row_f32
    if fused is None:
        fused = fused_bytes <= (vmem_limit * 7) // 10

    # ---- Fused single-pass path: one read + one write of x -----------------
    if fused:
        out = pl.pallas_call(
            functools.partial(_fused_kernel, inv_hw=1.0 / HW),
            out_shape=jax.ShapeDtypeStruct((B, C, HW), x.dtype),
            grid_spec=pltpu.PrefetchScalarGridSpec(
                num_scalar_prefetch=0,
                grid=(B,),
                in_specs=[
                    pl.BlockSpec((1, C, HW), lambda b: (b, 0, 0)),
                    pl.BlockSpec((Ch, C), lambda b: (0, 0)),
                    pl.BlockSpec((C, Ch), lambda b: (0, 0)),
                ],
                out_specs=pl.BlockSpec((1, C, HW), lambda b: (b, 0, 0)),
            ),
            compiler_params=pltpu.CompilerParams(
                dimension_semantics=("parallel",),
                vmem_limit_bytes=vmem_limit),
            cost_estimate=pl.CostEstimate(
                flops=3 * B * C * HW + 8 * B * C * Ch,
                transcendentals=B * C,
                bytes_accessed=2 * B * C * HW * itemsize),
        )(x, w1m, w2m)
        return out.reshape(B, C, H, W)

    # ---- Two-pass path (rows too large for VMEM) ---------------------------
    if tile_hw is None:
        tile_hw = _choose_tile_hw(C, HW, itemsize)
    n_hw = pl.cdiv(HW, tile_hw)
    ragged = (HW % tile_hw) != 0

    # Pass 1: pooling + MLP -> attn (B, C, 1)
    pool_kernel = functools.partial(
        _pool_mlp_kernel, hw_true=HW, tile_hw=tile_hw, ragged=ragged)
    attn = pl.pallas_call(
        pool_kernel,
        out_shape=jax.ShapeDtypeStruct((B, C, 1), jnp.float32),
        grid_spec=pltpu.PrefetchScalarGridSpec(
            num_scalar_prefetch=0,
            grid=(B, n_hw),
            in_specs=[
                pl.BlockSpec((1, C, tile_hw), lambda b, j: (b, 0, j)),
                pl.BlockSpec((Ch, C), lambda b, j: (0, 0)),
                pl.BlockSpec((C, Ch), lambda b, j: (0, 0)),
            ],
            out_specs=pl.BlockSpec((1, C, 1), lambda b, j: (b, 0, 0)),
            scratch_shapes=[
                pltpu.VMEM((C, 1), jnp.float32),   # running sum
                pltpu.VMEM((C, 1), jnp.float32),   # running max
            ],
        ),
        compiler_params=pltpu.CompilerParams(
            dimension_semantics=("parallel", "arbitrary"),
            vmem_limit_bytes=vmem_limit),
        cost_estimate=pl.CostEstimate(
            flops=2 * B * C * HW + 8 * B * C * Ch,
            transcendentals=B * C,
            bytes_accessed=B * C * HW * itemsize + B * C * 4),
    )(x, w1m, w2m)

    # Pass 2: out = attn * x (OOB lanes of the ragged last tile produce garbage
    # that is written only into the dropped out-of-bounds region).
    out = pl.pallas_call(
        _rescale_kernel,
        out_shape=jax.ShapeDtypeStruct((B, C, HW), x.dtype),
        grid_spec=pltpu.PrefetchScalarGridSpec(
            num_scalar_prefetch=0,
            grid=(B, n_hw),
            in_specs=[
                pl.BlockSpec((1, C, tile_hw), lambda b, j: (b, 0, j)),
                pl.BlockSpec((1, C, 1), lambda b, j: (b, 0, 0)),
            ],
            out_specs=pl.BlockSpec((1, C, tile_hw), lambda b, j: (b, 0, j)),
        ),
        compiler_params=pltpu.CompilerParams(
            dimension_semantics=("parallel", "parallel"),
            vmem_limit_bytes=vmem_limit),
        cost_estimate=pl.CostEstimate(
            flops=B * C * HW,
            transcendentals=0,
            bytes_accessed=2 * B * C * HW * itemsize + B * C * 4),
    )(x, attn)
    return out.reshape(B, C, H, W)


def _reference(x, w1, w2):
    Ch, C = w1.shape[0], w1.shape[1]
    avg = jnp.mean(x, axis=(2, 3))                            # (B, C)
    mx = jnp.max(x, axis=(2, 3))                              # (B, C)
    w1m = w1.reshape(Ch, C)
    w2m = w2.reshape(C, Ch)
    fc = lambda p: (jnp.maximum(p @ w1m.T, 0.0)) @ w2m.T
    return jax.nn.sigmoid(fc(avg) + fc(mx))[:, :, None, None] * x


if __name__ == "__main__":
    key = jax.random.PRNGKey(0)

    def make(k, B, C, H, W):
        Ch = C // 16
        kx, k1, k2 = jax.random.split(k, 3)
        x = jax.random.normal(kx, (B, C, H, W), dtype=jnp.float32)
        w1 = jax.random.normal(k1, (Ch, C, 1, 1), dtype=jnp.float32) * 0.1
        w2 = jax.random.normal(k2, (C, Ch, 1, 1), dtype=jnp.float32) * 0.1
        return x, w1, w2

    ka, kb, kc = jax.random.split(key, 3)

    # Case 1: canonical small shape -> fused single-pass path (grid over batch).
    x1, w11, w21 = make(ka, 2, 32, 16, 16)
    out1 = jax.block_until_ready(channel_attention(x1, w11, w21))
    ref1 = _reference(x1, w11, w21)
    assert jnp.allclose(out1, ref1, atol=1e-4, rtol=1e-4)

    # Case 2: two-pass path with a ragged last HW tile (HW=1600, tile=512 ->
    # 3 full tiles + 64 valid lanes), exercising the in-kernel lane masking
    # without any jnp.pad.  Forced at a small shape for coverage.
    x2, w12, w22 = make(kb, 1, 32, 40, 40)
    out2 = jax.block_until_ready(
        channel_attention(x2, w12, w22, fused=False, tile_hw=512))
    ref2 = _reference(x2, w12, w22)
    assert jnp.allclose(out2, ref2, atol=1e-4, rtol=1e-4)

    # Case 3: two-pass path with evenly dividing tiles (unmasked accumulate).
    x3, w13, w23 = make(kc, 2, 32, 32, 32)
    out3 = jax.block_until_ready(
        channel_attention(x3, w13, w23, fused=False, tile_hw=256))
    ref3 = _reference(x3, w13, w23)
    assert jnp.allclose(out3, ref3, atol=1e-4, rtol=1e-4)

    print("KERNEL_OK")
</pallas_src>

<mosaic_0001>
module attributes {stable_mosaic.version = 11 : i64} {
  func.func @_fused_kernel(%arg0: i32, %arg1: memref<1x32x256xf32, #tpu.memory_space<vmem>>, %arg2: memref<2x32xf32, #tpu.memory_space<vmem>>, %arg3: memref<32x2xf32, #tpu.memory_space<vmem>>, %arg4: memref<1x32x256xf32, #tpu.memory_space<vmem>>) attributes {dimension_semantics = [#tpu.dimension_semantics<parallel>], iteration_bounds = array<i64: 2>, scalar_prefetch = 0 : i64, scratch_operands = 0 : i64, tpu.core_type = #tpu.core_type<tc>, window_params = [{transform_indices = @transform_0, window_bounds = array<i64: 1, 32, 256>}, {pipeline_mode = #tpu.pipeline_mode<synchronous>, transform_indices = @transform_1, window_bounds = array<i64: 2, 32>}, {pipeline_mode = #tpu.pipeline_mode<synchronous>, transform_indices = @transform_2, window_bounds = array<i64: 32, 2>}, {transform_indices = @transform_3, window_bounds = array<i64: 1, 32, 256>}]} {
    %c0 = arith.constant 0 : index
    %c0_0 = arith.constant 0 : index
    %c0_1 = arith.constant 0 : index
    %0 = vector.load %arg1[%c0, %c0_0, %c0_1] : memref<1x32x256xf32, #tpu.memory_space<vmem>>, vector<1x32x256xf32>
    %1 = vector.shape_cast %0 : vector<1x32x256xf32> to vector<32x256xf32>
    %cst = arith.constant dense<0.000000e+00> : vector<32xf32>
    %2 = vector.multi_reduction <add>, %1, %cst [1] : vector<32x256xf32> to vector<32xf32>
    %3 = vector.shape_cast %2 : vector<32xf32> to vector<32x1xf32>
    %cst_2 = arith.constant 3.906250e-03 : f32
    %4 = vector.broadcast %cst_2 : f32 to vector<32x1xf32>
    %5 = arith.mulf %3, %4 : vector<32x1xf32>
    %cst_3 = arith.constant dense<0xFF800000> : vector<32xf32>
    %6 = vector.multi_reduction <maximumf>, %1, %cst_3 [1] : vector<32x256xf32> to vector<32xf32>
    %7 = vector.shape_cast %6 : vector<32xf32> to vector<32x1xf32>
    %8 = tpu.concatenate %5, %7 in 1 : vector<32x1xf32>, vector<32x1xf32> -> vector<32x2xf32>
    %c0_4 = arith.constant 0 : index
    %c0_5 = arith.constant 0 : index
    %9 = vector.load %arg2[%c0_4, %c0_5] : memref<2x32xf32, #tpu.memory_space<vmem>>, vector<2x32xf32>
    %cst_6 = arith.constant dense<0.000000e+00> : vector<2x2xf32>
    %10 = tpu.matmul %9, %8, %cst_6 {dimension_numbers = #tpu.dot_dimension_numbers<[1], [0], [0], [1], [0, 0, 1, 1], [], []>} : vector<2x32xf32>, vector<32x2xf32>, vector<2x2xf32> -> vector<2x2xf32>
    %cst_7 = arith.constant 0.000000e+00 : f32
    %11 = vector.broadcast %cst_7 : f32 to vector<2x2xf32>
    %12 = arith.maximumf %10, %11 : vector<2x2xf32>
    %c0_8 = arith.constant 0 : index
    %c0_9 = arith.constant 0 : index
    %13 = vector.load %arg3[%c0_8, %c0_9] : memref<32x2xf32, #tpu.memory_space<vmem>>, vector<32x2xf32>
    %cst_10 = arith.constant dense<0.000000e+00> : vector<32x2xf32>
    %14 = tpu.matmul %13, %12, %cst_10 {dimension_numbers = #tpu.dot_dimension_numbers<[1], [0], [0], [1], [0, 0, 1, 1], [], []>} : vector<32x2xf32>, vector<2x2xf32>, vector<32x2xf32> -> vector<32x2xf32>
    %15 = vector.extract_strided_slice %14 {offsets = [0, 0], sizes = [32, 1], strides = [1, 1]} : vector<32x2xf32> to vector<32x1xf32>
    %16 = vector.extract_strided_slice %14 {offsets = [0, 1], sizes = [32, 1], strides = [1, 1]} : vector<32x2xf32> to vector<32x1xf32>
    %17 = arith.addf %15, %16 : vector<32x1xf32>
    %18 = arith.negf %17 : vector<32x1xf32>
    %19 = math.exp %18 : vector<32x1xf32>
    %cst_11 = arith.constant 1.000000e+00 : f32
    %20 = vector.broadcast %cst_11 : f32 to vector<32x1xf32>
    %21 = arith.addf %20, %19 : vector<32x1xf32>
    %22 = arith.divf %20, %21 : vector<32x1xf32>
    %23 = vector.broadcast %22 : vector<32x1xf32> to vector<32x256xf32>
    %24 = arith.mulf %1, %23 : vector<32x256xf32>
    %c0_12 = arith.constant 0 : index
    %c0_13 = arith.constant 0 : index
    %c0_14 = arith.constant 0 : index
    %25 = vector.load %arg4[%c0_12, %c0_13, %c0_14] : memref<1x32x256xf32, #tpu.memory_space<vmem>>, vector<1x32x256xf32>
    %26 = vector.shape_cast %25 : vector<1x32x256xf32> to vector<32x256xf32>
    %27 = vector.shape_cast %24 : vector<32x256xf32> to vector<1x32x256xf32>
    tpu.vector_store %arg4[%c0_12, %c0_13, %c0_14], %27 {strides = array<i32>} : memref<1x32x256xf32, #tpu.memory_space<vmem>>, vector<1x32x256xf32>,
    return
  }
  func.func @transform_0(%arg0: i32) -> (i32, i32, i32) {
    %c0_i32 = arith.constant 0 : i32
    %c0_i32_0 = arith.constant 0 : i32
    %c0_i32_1 = arith.constant 0 : i32
    return %arg0, %c0_i32, %c0_i32_0 : i32, i32, i32
  }
  func.func @transform_1(%arg0: i32) -> (i32, i32) {
    %c0_i32 = arith.constant 0 : i32
    %c0_i32_0 = arith.constant 0 : i32
    %c0_i32_1 = arith.constant 0 : i32
    return %c0_i32, %c0_i32_0 : i32, i32
  }
  func.func @transform_2(%arg0: i32) -> (i32, i32) {
    %c0_i32 = arith.constant 0 : i32
    %c0_i32_0 = arith.constant 0 : i32
    %c0_i32_1 = arith.constant 0 : i32
    return %c0_i32, %c0_i32_0 : i32, i32
  }
  func.func @transform_3(%arg0: i32) -> (i32, i32, i32) {
    %c0_i32 = arith.constant 0 : i32
    %c0_i32_0 = arith.constant 0 : i32
    %c0_i32_1 = arith.constant 0 : i32
    return %arg0, %c0_i32, %c0_i32_0 : i32, i32, i32
  }
}

</mosaic_0001>

<bundles_post_ra>
// kernel: tpu_custom_call.1
= control target key start
LH: loop header
LB: loop body
LE: loop exit
PB: predicated region body
PF: predicated region fallthrough
CT: control target
= control target key end

     0   :  { %8 = vsyncpa [#allocation3], 0  ;;  %s1047_s0 = inlined_call_operand.hbm [shape: f32[2,32,256], index: 0, kind: input, shape index: {}]   ;;  %s1048_s1 = inlined_call_operand.vmem [shape: f32[2,32], index: 1, kind: input, shape index: {}]   ;;  %s1049_s2 = inlined_call_operand.vmem [shape: f32[32,2], index: 2, kind: input, shape index: {}]   ;;  %s1050_s3 = inlined_call_operand.hbm [shape: f32[2,32,256], index: 3, kind: output, shape index: {}]  }
   0x1   :  { %10 = vsyncpa [#allocation3 + $0x1], 0 }
   0x2   :  { %11 = vsyncpa [#allocation4], 0 }
   0x3   :  { %13 = vsyncpa [#allocation4 + $0x1], 0  ;;  %s830_s12 = smov 0   ;;  %s832_s13 = smov 0  }
   0x4   :  { %s834_s14 = smov 0   ;;  %s836_s15 = smov 0  }
   0x5 LB: > { %s851_s16 = sadd.s32 4294967295, %s798_s15   ;;  %s579_s17 = sadd.s32 4294967294, %s798_s15   ;;  %s798_s15 = sphi %s836_s15, %s1065_s15   ;;  %s794_s14 = sphi %s834_s14, %s1064_s14   ;;  %s790_s13 = sphi %s832_s13, %s1063_s13   ;;  %s786_s12 = sphi %s830_s12, %s1062_s12  }
   0x6   : > { %s855_s18 = sadd.s32 1, %s798_s15   ;;  %s26_s19 = sadd.s32 1, %s794_s14 }
   0x7   : > { %s23_s20 = ssub.s32 %s798_s15, %s855_s18  ;;  %p33_p0 = scmp.ne.s32.totalorder %s794_s14, %s790_s13 }
   0x8   : > { %p24_p1 = scmp.eq.s32.totalorder %s23_s20, 0  ;;  %p34_p2 = scmp.eq.s32.totalorder %s798_s15, 0 }
   0x9   : > { %p39_p3 = scmp.ne.s32.totalorder %s790_s13, %s786_s12  ;;  %p40_p4 = scmp.eq.s32.totalorder %s851_s16, 0 }
   0xa   : > { %s867_s21 = scalar_select %p24_p1, %s794_s14, %s26_s19  }
   0xb   : > { %p869_p5 = por %p34_p2, %p33_p0  ;;  %p873_p6 = por %p40_p4, %p39_p3 }
   0xc   : > { %p105_p7 = scmp.eq.s32.totalorder %s851_s16, 1  ;;  %p111_p8 = scmp.eq.s32.totalorder %s579_s17, 1 }
   0xd   : > { %s1054_s23 = scalar_select %p873_p6, 1, 0 }
   0xe   : > { %p646_p10 = scmp.lt.s32.totalorder %s798_s15, 2  ;;  %p880_p11 = por %p105_p7, %p33_p0 }
   0xf   : > { %p884_p12 = por %p111_p8, %p39_p3  ;;  %s137_s26 = sand.u32 1, %s794_s14  }
  0x10   : > { %s1055_s24 = scalar_select %p880_p11, 1, 0 }
  0x11   : > { %s1056_s25 = scalar_select %p884_p12, 1, 0 }
  0x12   : > { %s603_s27 = sshll.u32 %s798_s15, 10  ;;  %s582_s28 = sshll.u32 %s137_s26, 6 }
  0x13   : > { %s893_s4 = scalar_lea.hbm %s1047_s0, %s603_s27  ;;  %s141_s5 = scalar_lea.vmem [#allocation2], %s582_s28 }
  0x14   : > { %s148_s6 = sshll.u32 %s141_s5, 4  ;;  %p897_p13 = pnand %p646_p10, %p869_p5  ;;  %s901_s6 = int_to_ptr.vmem [resolvable:$true] %s148_s6 }
  0x15   : > { %s903_s8 = scalar_lea.sflag [#allocation3], %s137_s26  ;;  %s706_s9 = scalar_lea.hbm %s893_s4, 1024 }
  0x16   : > { %p707_p0 = scmp.ne.s32.totalorder %s893_s4, %s706_s9  ;;  %p708_p1 = pneg %p897_p13 }
  0x17   : > { %s711_s17 = scalar_lea.hbm %s1047_s0, 2048  ;;  %p712_p4 = scmp.lt.s32.totalorder %s893_s4, %s1047_s0 }
  0x18   : > { %p709_p2 = pnand %p708_p1, %p707_p0  ;;  %p713_p5 = scmp.lt.s32.totalorder %s711_s17, %s706_s9 }
  0x1a   : > { %p710_p3 = pneg %p709_p2  ;;  %p714_p7 = por %p713_p5, %p712_p4 }
  0x1c   : > { %p715_p8 = pnand %p714_p7, %p710_p3 }
  0x1e   : > { %718 = shalt.err (!%p715_p8)
}
  0x1f   : > { %s719_s22 = scalar_lea.vmem %s901_s6, 1024  ;;  %s800_s26 = smov [#allocation2]  }
  0x20   : > { %p720_p10 = scmp.ne.s32.totalorder %s901_s6, %s719_s22  ;;  %s724_s27 = sshll.u32 %s800_s26, 4  ;;  %s725_s27 = int_to_ptr.vmem [resolvable:$false] %s724_s27 }
  0x21   : > { %s726_s28 = scalar_lea.vmem %s725_s27, 2048  ;;  %p727_p2 = scmp.lt.s32.totalorder %s901_s6, %s725_s27 }
  0x22   : > { %p722_p9 = pnand %p720_p10, %p708_p1  ;;  %p728_p12 = scmp.lt.s32.totalorder %s726_s28, %s719_s22 }
  0x24   : > { %p723_p0 = pneg %p722_p9  ;;  %p729_p11 = por %p728_p12, %p727_p2 }
  0x26   : > { %p730_p6 = pnand %p729_p11, %p723_p0 }
  0x28   : > { %733 = shalt.err (!%p730_p6)
}
  0x29   : > { %s801_s29 = smov 256   ;;  %s802_s30 = smov 16  }
  0x2a   : > { %641 = dma.hbm_to_vmem [thread:$0]  (!%p897_p13), %s893_s4, 1024, %s901_s6, %s903_s8, %s801_s29, %s801_s29, %s802_s30  }
  0x2b   : > { %p585_p9 = scmp.ge.s32.totalorder %s798_s15, 1  ;;  %p156_p1 = scmp.lt.s32.totalorder %s798_s15, 3 }
  0x2d   : > { %p157_p3 = pnand %p585_p9, %p156_p1 }
  0x2e   : > { %s927_s5 = sand.u32 (!%p157_p3), 1, %s790_s13   ;;  %p1058_p6 = scmp.ne.s32.totalorder (!%p157_p3), %s1054_s23, 0 }
  0x2f   : > { %160 = sbr.rel (%p157_p3) target bundleno = 899 (0x383), region = 32  ;;  %s586_s9 = sshll.u32 (!%p157_p3), %s927_s5, 6 }
  0x30   : > { %s163_s10 = scalar_lea.sflag (!%p157_p3), [#allocation3], %s927_s5  ;;  %s166_s11 = scalar_lea.vmem (!%p157_p3), [#allocation2], %s586_s9 }
  0x34   : > { %777 = dma.done.wait (%p1058_p6), %s163_s10, 1024  }
  0x35   : > { %779 = vsyncadd (%p1058_p6), %s163_s10, 4294966272  ;;  %v937_v0 = vld [vmem:[%s166_s11 + $0x30] sm:$0xff]  ;;  %v939_v1 = vld [vmem:[%s166_s11 + $0x38] sm:$0xff]  ;;  %v803_v16 = vmov 0.0   ;;  %vm804_vm0 = vmmov 0   ;;  %vm225_vm1 = vcmask 7168  }
  0x36   : > { %v941_v2 = vld [vmem:[%s166_s11 + $0x20] sm:$0xff]  ;;  %v222_v3 = vmax.f32 %v937_v0, %v939_v1  ;;  %v206_v4 = vadd.f32 %v939_v1, %v937_v0  ;;  %v947_v5 = vld [vmem:[%s166_s11 + $0x28] sm:$0xff]  ;;  %v949_v6 = vld [vmem:[%s166_s11 + $0x10] sm:$0xff]  ;;  %615 = vmatprep.subr.mxu0 %v803_v16  ;;  %623 = vmatprep.mubr.msk.f32.mxu0 %vm804_vm0, %v803_v16  ;;  %vm231_vm2 = vcmask 261120   ;;  %vm310_vm3 = vcmask 15360   ;;  %s805_s27 = smov 127  }
  0x37   : > { %v951_v7 = vld [vmem:[%s166_s11 + $0x18] sm:$0xff]  ;;  %v203_v8 = vadd.f32 %v947_v5, %v941_v2  ;;  %v957_v10 = vld [vmem:[%s166_s11] sm:$0xff]  ;;  %v959_v11 = vld [vmem:[%s166_s11 + $0x8] sm:$0xff]  ;;  %v219_v12 = vmax.f32 %v941_v2, %v947_v5  ;;  %vm323_vm4 = vcmask 1041408   ;;  %v806_v45 = vmov 0   ;;  %s188_s28 = scalar_lea.vmem [#allocation5], %s586_s9 }
  0x38   : > { %223 = vmax.xlane.f32.xlu1 %v222_v3  ;;  %207 = vadd.xlane.f32.xlu0 %v206_v4  ;;  %v200_v9 = vadd.f32 %v951_v7, %v949_v6  ;;  %v197_v13 = vadd.f32 %v959_v11, %v957_v10  ;;  %v216_v14 = vmax.f32 %v949_v6, %v951_v7  ;;  %v230_v32 = vld [vmem:[%s1048_s1] sm:$0x3]  ;;  %v307_v38 = vld [vmem:[%s1049_s2 + $0x8] sm:$0xff]  ;;  %v308_v39 = vld [vmem:[%s1049_s2 + $0x10] sm:$0xff]  ;;  %s506_s29 = sshll.u32 %s188_s28, 4  ;;  %s604_s30 = sshll.u32 %s851_s16, 10  ;;  %s997_s29 = int_to_ptr.vmem [resolvable:$true] %s506_s29 }
  0x39   : > { %v213_v15 = vmax.f32 %v957_v10, %v959_v11  ;;  %v306_v34 = vld [vmem:[%s1049_s2] sm:$0xff]  ;;  %v309_v40 = vld [vmem:[%s1049_s2 + $0x18] sm:$0xff]  ;;  %688 = vset.pattern.permute.xlu1 %v806_v45  ;;  %689 = vset.pattern.permute.xlu0 %v806_v45  ;;  %s1002_s11 = scalar_lea.hbm %s1050_s3, %s604_s30  ;;  %s493_s16 = scalar_lea.sflag [#allocation4], %s927_s5 }
  0x3a   : > { %628 = vmatprep.mubr.msk.f32.mxu1 %vm310_vm3, %v306_v34  ;;  %s734_s23 = scalar_lea.vmem %s997_s29, 1024  ;;  %p1059_p12 = scmp.ne.s32.totalorder %s1055_s24, 0 }
  0x3b   : > { %p735_p11 = scmp.ne.s32.totalorder %s997_s29, %s734_s23  ;;  %s807_s4 = smov [#allocation5]  }
  0x3c   : > { %204 = vadd.xlane.f32.xlu0 %v203_v8  ;;  %201 = vadd.xlane.f32.xlu1 %v200_v9  ;;  %s738_s6 = sshll.u32 %s807_s4, 4  ;;  %s739_s6 = int_to_ptr.vmem [resolvable:$false] %s738_s6 }
  0x3d   : > { %p736_p13 = pnand %p735_p11, %p1059_p12  ;;  %s740_s7 = scalar_lea.vmem %s739_s6, 2048 }
  0x3e   : > { %p741_p5 = scmp.lt.s32.totalorder %s997_s29, %s739_s6  ;;  %p742_p7 = scmp.lt.s32.totalorder %s740_s7, %s734_s23 }
  0x3f   : > { %p737_p4 = pneg %p736_p13 }
  0x40   : > { %220 = vmax.xlane.f32.xlu0 %v219_v12  ;;  %198 = vadd.xlane.f32.xlu1 %v197_v13  ;;  %p743_p8 = por %p742_p7, %p741_p5 }
  0x42   : > { %p744_p10 = pnand %p743_p8, %p737_p4 }
  0x44   : > { %217 = vmax.xlane.f32.xlu0 %v216_v14  ;;  %214 = vmax.xlane.f32.xlu1 %v213_v15 }
  0xc1   : > { %v224_v17 = vpop.xlane.xlu1 %223  ;;  %v208_v18 = vpop.xlane.xlu0 %207 }
  0xc2   : > { %v212_v19 = vmul.f32 0.00390625, %v208_v18 }
  0xc4   : > { %v229_v20 = vsel %vm225_vm1, %v212_v19, %v224_v17 }
  0xc5   : > { %616 = vmatpush3.msra.mxu0 %v229_v20  ;;  %v205_v21 = vpop.xlane.xlu0 %204  ;;  %v202_v22 = vpop.xlane.xlu1 %201 }
  0xc6   : > { %617 = vmatprep.subr.mxu0 %v803_v16  ;;  %v211_v23 = vmul.f32 0.00390625, %v205_v21  ;;  %v210_v27 = vmul.f32 0.00390625, %v202_v22 }
  0xc9   : > { %v221_v24 = vpop.xlane.xlu0 %220  ;;  %v199_v25 = vpop.xlane.xlu1 %198 }
  0xca   : > { %v228_v26 = vsel %vm225_vm1, %v211_v23, %v221_v24  ;;  %v209_v28 = vmul.f32 0.00390625, %v199_v25 }
  0xcb   : > { %618 = vmatpush3.msra.mxu0 %v228_v26 }
  0xcc   : > { %619 = vmatprep.subr.mxu0 %v803_v16 }
  0xcd   : > { %v218_v29 = vpop.xlane.xlu0 %217  ;;  %v215_v30 = vpop.xlane.xlu1 %214 }
  0xce   : > { %v227_v31 = vsel %vm225_vm1, %v210_v27, %v218_v29  ;;  %v226_v33 = vsel %vm225_vm1, %v209_v28, %v215_v30 }
  0xcf   : > { %620 = vmatpush3.msra.mxu0 %v227_v31 }
  0xd0   : > { %621 = vmatprep.subr.mxu0 %v803_v16 }
  0xd1   : > { %622 = vmatpush3.msra.mxu0 %v226_v33 }
  0xd2   : > { %624 = vmatmul.mubr.msk.f32.vlgmr.msra.gmra.mxu0 %vm231_vm2, %v230_v32 }
 0x192   : > { %v301_v35 = vpop.f32.mrf.mxu0 }
 0x193   : > { %v305_v36 = vmax.f32 %v301_v35, 0.0 }
 0x194   : > { %v625_v37 = vpop.f32.mrf.mxu0 }
 0x195   : > { %626 = vmatprep.subr.msk.mxu1 %vm323_vm4, %v305_v36 }
 0x196   : > { %627 = vmatpush3.msk.msra.mxu1 %vm323_vm4, %v305_v36 }
 0x197   : > { %629 = vmatmul.mubr.msk.f32.vlgmr.msra.gmra.mxu1 %vm310_vm3, %v307_v38 }
 0x198   : > { %631 = vmatprep.mubr.msk.f32.mxu1 %vm310_vm3, %v308_v39 }
 0x19b   : > { %632 = vmatmul.mubr.msk.f32.gmra.mxu1 %vm310_vm3, %v309_v40 }
 0x257   : > { %v630_v41 = vpop.f32.mrf.mxu1 }
 0x258   : > { %418 = vrot.lane.b32.xlu1 %v630_v41, %s805_s27 }
 0x259   : > { %v393_v42 = vpop.f32.mrf.mxu1 }
 0x25a   : > { %416 = vrot.lane.b32.xlu0 %v393_v42, %s805_s27 }
 0x25b   : > { %v633_v43 = vpop.f32.mrf.mxu1 }
 0x25d   : > { %v403_v44 = vpop.f32.mrf.mxu1 }
 0x25e   : > { %420 = vrot.lane.b32.xlu1 %v403_v44, %s805_s27 }
 0x262   : > { %422 = vrot.lane.b32.xlu1 %v633_v43, %s805_s27 }
 0x2ca   : > { %v419_v46 = vpop.permute.xlu1 %418 }
 0x2cb   : > { %v429_v47 = vadd.f32 %v630_v41, %v419_v46 }
 0x2cc   : > { %v417_v48 = vpop.permute.xlu0 %416 }
 0x2cd   : > { %v595_v49 = vmul.f32 -1.442695, %v429_v47  ;;  %v428_v50 = vadd.f32 %v417_v48, %v393_v42 }
 0x2cf   : > { %690 = vpow2.f32 %v595_v49  ;;  %v594_v51 = vmul.f32 -1.442695, %v428_v50 }
 0x2d0   : > { %v421_v52 = vpop.permute.xlu1 %420 }
 0x2d1   : > { %692 = vpow2.f32 %v594_v51  ;;  %v430_v53 = vadd.f32 %v421_v52, %v403_v44 }
 0x2d3   : > { %v596_v54 = vmul.f32 -1.442695, %v430_v53 }
 0x2d4   : > { %v423_v55 = vpop.permute.xlu1 %422 }
 0x2d5   : > { %694 = vpow2.f32 %v596_v54  ;;  %v431_v56 = vadd.f32 %v633_v43, %v423_v55 }
 0x2d7   : > { %v597_v57 = vmul.f32 -1.442695, %v431_v56 }
 0x2d9   : > { %696 = vpow2.f32 %v597_v57 }
 0x2dc   : > { %v691_v58 = vpop.eup %690 }
 0x2dd   : > { %v445_v59 = vadd.f32 1.0, %v691_v58 }
 0x2de   : > { %v693_v60 = vpop.eup %692 }
 0x2df   : > { %698 = vrcp.f32 %v445_v59  ;;  %v444_v61 = vadd.f32 1.0, %v693_v60 }
 0x2e1   : > { %700 = vrcp.f32 %v444_v61 }
 0x2e2   : > { %v695_v62 = vpop.eup %694 }
 0x2e3   : > { %v446_v63 = vadd.f32 1.0, %v695_v62 }
 0x2e5   : > { %702 = vrcp.f32 %v446_v63 }
 0x2e6   : > { %v697_v3 = vpop.eup %696 }
 0x2e7   : > { %v447_v4 = vadd.f32 1.0, %v697_v3 }
 0x2e9   : > { %704 = vrcp.f32 %v447_v4 }
 0x2ec   : > { %v699_v8 = vpop.eup %698 }
 0x2ed   : > { %463 = vperm.xlu1 %688, %v699_v8  }
 0x2ee   : > { %v701_v9 = vpop.eup %700 }
 0x2ef   : > { %458 = vperm.xlu0 %689, %v701_v9  }
 0x2f2   : > { %v703_v12 = vpop.eup %702 }
 0x2f3   : > { %468 = vperm.xlu1 %688, %v703_v12  }
 0x2f6   : > { %v705_v13 = vpop.eup %704 }
 0x2f7   : > { %473 = vperm.xlu0 %689, %v705_v13  }
 0x368   : > { %v464_v14 = vpop.permute.xlu1 %463 }
 0x369   : > { %v478_v15 = vmul.f32 %v464_v14, %v949_v6  ;;  %v479_v16 = vmul.f32 %v464_v14, %v951_v7 }
 0x36a   : > { %v459_v17 = vpop.permute.xlu0 %458 }
 0x36b   : > { %486 = vst [vmem:[%s188_s28 + $0x10] sm:$0xff] %v478_v15  ;;  %487 = vst [vmem:[%s188_s28 + $0x18] sm:$0xff] %v479_v16  ;;  %v476_v18 = vmul.f32 %v459_v17, %v957_v10  ;;  %v477_v19 = vmul.f32 %v459_v17, %v959_v11 }
 0x36d   : > { %484 = vst [vmem:[%s188_s28] sm:$0xff] %v476_v18  ;;  %485 = vst [vmem:[%s188_s28 + $0x8] sm:$0xff] %v477_v19 }
 0x36e   : > { %v469_v20 = vpop.permute.xlu1 %468 }
 0x36f   : > { %v480_v21 = vmul.f32 %v469_v20, %v941_v2  ;;  %v481_v6 = vmul.f32 %v469_v20, %v947_v5 }
 0x371   : > { %488 = vst [vmem:[%s188_s28 + $0x20] sm:$0xff] %v480_v21  ;;  %489 = vst [vmem:[%s188_s28 + $0x28] sm:$0xff] %v481_v6 }
 0x372   : > { %v474_v7 = vpop.permute.xlu0 %473 }
 0x373   : > { %v482_v10 = vmul.f32 %v474_v7, %v937_v0  ;;  %v483_v2 = vmul.f32 %v474_v7, %v939_v1 }
 0x375   : > { %490 = vst [vmem:[%s188_s28 + $0x30] sm:$0xff] %v482_v10  ;;  %491 = vst [vmem:[%s188_s28 + $0x38] sm:$0xff] %v483_v2 }
 0x376   : > { %747 = shalt.err (!%p744_p10)
}
 0x377   : > { %s748_s8 = scalar_lea.hbm %s1002_s11, 1024  ;;  %s752_s20 = scalar_lea.hbm %s1050_s3, 2048 }
 0x378   : > { %p749_p0 = scmp.ne.s32.totalorder %s1002_s11, %s748_s8  ;;  %p753_p1 = scmp.lt.s32.totalorder %s1002_s11, %s1050_s3 }
 0x379   : > { %p754_p3 = scmp.lt.s32.totalorder %s752_s20, %s748_s8 }
 0x37a   : > { %p750_p2 = pnand %p749_p0, %p1059_p12 }
 0x37b   : > { %p755_p6 = por %p754_p3, %p753_p1 }
 0x37c   : > { %p751_p9 = pneg %p750_p2 }
 0x37e   : > { %p756_p11 = pnand %p755_p6, %p751_p9 }
 0x380   : > { %759 = shalt.err (!%p756_p11)
}
 0x381   : > { %s808_s27 = smov 256   ;;  %s809_s28 = smov 16  }
 0x382   : > { %636 = dma.vmem_to_hbm [thread:$0]  (%p1059_p12), %s997_s29, 1024, %s1002_s11, %s493_s16, %s808_s27, %s808_s27, %s809_s28  }
 0x383 PF: > { %s521_s30 = sand.u32 1, %s786_s12   ;;  %p1060_p13 = scmp.ne.s32.totalorder %s1056_s25, 0 }
 0x384   : > { %p1061_p4 = scmp.ge.s32.totalorder %s798_s15, 2  ;;  %s522_s9 = scalar_lea.sflag [#allocation4], %s521_s30 }
 0x386   : > { %p643_p5 = pnand %p1061_p4, %p1060_p13 }
 0x388   : > { %p644_p7 = pneg %p643_p5 }
 0x38a   : > { %781 = dma.done.wait (%p644_p7), %s522_s9, 1024  }
 0x38b   : > { %783 = vsyncadd (%p644_p7), %s522_s9, 4294966272  ;;  %p16_p8 = scmp.ge.s32.totalorder %s855_s18, 4   ;;  %s1062_s12 = smov %s790_s13 }
 0x38c   : > { %s1063_s13 = smov %s794_s14  ;;  %s1064_s14 = smov %s867_s21 }
 0x38d   : > { %s1065_s15 = smov %s855_s18  ;;  %18 = sbr.rel (!%p16_p8) target bundleno = 5 (0x5), region = 77 }
 0x392   :  { %527 = vsyncpa [#allocation3], 1 }
 0x393   :  { %529 = vsyncpa [#allocation3 + $0x1], 1 }
 0x394   :  { %530 = vsyncpa [#allocation4], 1 }
 0x395   :  { %532 = vsyncpa [#allocation4 + $0x1], 1 }

</bundles_post_ra>
